<compile_context>
chip_gen: v6e
topology: v6e:2x2x1
jax: 0.10.0
libtpu: 0.0.40
codegen_flags: <defaults>
</compile_context>

<pallas_src>
import jax
import jax.numpy as jnp
from jax.experimental import pallas as pl
from jax.experimental.pallas import tpu as pltpu

DEFAULT_EPS = 0.5
DEFAULT_B = 3.0


def _round_up(x, m):
    return ((x + m - 1) // m) * m


def _cdiv(a, b):
    return (a + b - 1) // b


def _le_kernel(x_ref, w_ref, b_ref, o_ref):
    # x_ref: (TILE_B, n_vars) f32 VMEM tile (double-buffered over the batch grid)
    # w_ref: (1, n_vars)      f32 VMEM, constant block index -> stays resident
    # b_ref: (1,)             f32 SMEM scalar = B * (bias - eps)
    # o_ref: (1, TILE_B)      f32 lane-dense output row for this tile
    x = x_ref[...]
    w = w_ref[...]                              # broadcasts over rows (sublanes)
    # expr' = x @ (B*w): VPU multiply + XLU cross-lane reduce (no MXU needed).
    z = jnp.sum(x * w, axis=-1) + b_ref[0]      # (TILE_B,)
    # le(x) = 1 - sigmoid(B*(expr - eps)) == sigmoid(-z)   (stable form)
    # Lane-dense store: one row of TILE_B lanes instead of a (TILE_B, 1)
    # column of masked vst.msk stores.
    o_ref[...] = jax.nn.sigmoid(-z)[None, :]
    # TODO(synk): if profiling shows vld/VPU bound for n_vars << 128, pack
    # k = 128 // n_vars rows per vreg (wrapper reshape + segmented lane reduce).


def _choose_tile_b(batch, n_vars, target_bytes=4 << 20):
    """Rows per tile, sized against the lane-padded VMEM footprint (~4 MiB)."""
    lane_padded = _round_up(n_vars, 128)        # lanes pad to 128 in VMEM
    tile = max(1024, (target_bytes // (4 * lane_padded)) // 1024 * 1024)
    # Keep >= 2 grid steps when the batch allows it, so v7x's two TensorCores
    # both get work and the pipeline has something to overlap.
    if batch > 2 * 1024:
        tile = min(tile, _round_up(_cdiv(batch, 2), 1024))
    tile = min(tile, _round_up(batch, 8))
    return max(8, (tile // 8) * 8)


def le_forward(xs, w, bias, B=DEFAULT_B, eps=DEFAULT_EPS):
    """xs: (batch, n_vars) f32; w: (n_vars, 1) f32; bias: (1, 1) f32."""
    batch, n_vars = xs.shape
    xs = xs.astype(jnp.float32)

    # Fold B and eps into the tiny linear parameters (wrapper-side XLA ops on
    # n_vars elements -- negligible):
    #   1 - sigmoid(B*(x@w + bias - eps)) = sigmoid(-(x@(B*w) + B*(bias - eps)))
    w_row = (B * w.astype(jnp.float32)).reshape(1, n_vars)
    b_fold = (B * (bias.astype(jnp.float32).reshape(()) - eps)).reshape(1)

    tile_b = _choose_tile_b(batch, n_vars)
    num_tiles = _cdiv(batch, tile_b)

    # VMEM budget against the lane-padded footprint: double-buffered xs tiles
    # + double-buffered output rows + resident weights, plus headroom. Stays
    # well under v7x's 64 MiB/TC; raising the limit keeps Buffered(2) on v5e.
    lane_padded = _round_up(n_vars, 128)
    vmem_needed = (2 * tile_b * lane_padded * 4      # xs double buffer
                   + 2 * tile_b * 4                  # output rows
                   + 2 * 8 * lane_padded * 4)        # weights
    vmem_limit = int(min(max(vmem_needed + (4 << 20), 16 << 20), 56 << 20))

    # TODO(synk): if n_vars grows beyond ~2K, add a second "arbitrary" grid axis
    # over n_vars with a small VMEM accumulator (init/finalize via pl.when).
    out = pl.pallas_call(
        _le_kernel,
        out_shape=jax.ShapeDtypeStruct((num_tiles, tile_b), jnp.float32),
        grid_spec=pltpu.PrefetchScalarGridSpec(
            num_scalar_prefetch=0,
            grid=(num_tiles,),
            in_specs=[
                pl.BlockSpec((tile_b, n_vars), lambda i: (i, 0)),   # xs tile
                pl.BlockSpec((1, n_vars), lambda i: (0, 0)),        # folded weights
                pl.BlockSpec(memory_space=pltpu.SMEM),              # folded bias scalar
            ],
            out_specs=pl.BlockSpec((1, tile_b), lambda i: (i, 0)),  # lane-dense row
        ),
        compiler_params=pltpu.CompilerParams(
            dimension_semantics=("parallel",),
            vmem_limit_bytes=vmem_limit,
        ),
    )(xs, w_row, b_fold)

    # Rows past `batch` in the final tile come from boundary-block garbage
    # reads; they never feed any cross-row computation and are sliced off here.
    return out.reshape(-1)[:batch].reshape(batch, 1)


def le_reference(xs, w, bias, B=DEFAULT_B, eps=DEFAULT_EPS):
    expr = xs @ w + bias
    return 1.0 - jax.nn.sigmoid(B * (expr - eps))


if __name__ == "__main__":
    key = jax.random.PRNGKey(0)
    k_x, k_w, k_b = jax.random.split(key, 3)

    batch, n_vars = 8, 32
    xs = jax.random.normal(k_x, (batch, n_vars), dtype=jnp.float32)
    w = jax.random.normal(k_w, (n_vars, 1), dtype=jnp.float32) * 0.1
    bias = jax.random.normal(k_b, (1, 1), dtype=jnp.float32) * 0.1

    out = jax.block_until_ready(le_forward(xs, w, bias, B=DEFAULT_B, eps=DEFAULT_EPS))
    ref = le_reference(xs, w, bias, B=DEFAULT_B, eps=DEFAULT_EPS)
    assert out.shape == (batch, 1)
    assert jnp.allclose(out, ref, atol=1e-5, rtol=1e-5)

    # Non-divisible batch / boundary-block path (no wrapper-side padding).
    batch2 = 1000
    xs2 = jax.random.normal(k_x, (batch2, n_vars), dtype=jnp.float32)
    out2 = jax.block_until_ready(le_forward(xs2, w, bias))
    ref2 = le_reference(xs2, w, bias)
    assert out2.shape == (batch2, 1)
    assert jnp.allclose(out2, ref2, atol=1e-5, rtol=1e-5)

    # Multi-tile pipelined path (num_tiles >= 2) with a ragged final tile.
    batch3 = 5000
    xs3 = jax.random.normal(k_x, (batch3, n_vars), dtype=jnp.float32)
    out3 = jax.block_until_ready(le_forward(xs3, w, bias))
    ref3 = le_reference(xs3, w, bias)
    assert out3.shape == (batch3, 1)
    assert jnp.allclose(out3, ref3, atol=1e-5, rtol=1e-5)

    print("KERNEL_OK")
</pallas_src>

<mosaic_0001>
module attributes {stable_mosaic.version = 11 : i64} {
  func.func @_le_kernel(%arg0: i32, %arg1: memref<8x32xf32, #tpu.memory_space<vmem>>, %arg2: memref<1x32xf32, #tpu.memory_space<vmem>>, %arg3: memref<1xf32, #tpu.memory_space<smem>>, %arg4: memref<1x8xf32, #tpu.memory_space<vmem>>) attributes {dimension_semantics = [#tpu.dimension_semantics<parallel>], iteration_bounds = array<i64: 1>, scalar_prefetch = 0 : i64, scratch_operands = 0 : i64, tpu.core_type = #tpu.core_type<tc>, window_params = [{transform_indices = @transform_0, window_bounds = array<i64: 8, 32>}, {pipeline_mode = #tpu.pipeline_mode<synchronous>, transform_indices = @transform_1, window_bounds = array<i64: 1, 32>}, {transform_indices = @transform_2, window_bounds = array<i64: 1>}, {transform_indices = @transform_3, window_bounds = array<i64: 1, 8>}]} {
    %c0 = arith.constant 0 : index
    %c0_0 = arith.constant 0 : index
    %0 = vector.load %arg1[%c0, %c0_0] : memref<8x32xf32, #tpu.memory_space<vmem>>, vector<8x32xf32>
    %c0_1 = arith.constant 0 : index
    %c0_2 = arith.constant 0 : index
    %1 = vector.load %arg2[%c0_1, %c0_2] : memref<1x32xf32, #tpu.memory_space<vmem>>, vector<1x32xf32>
    %2 = vector.broadcast %1 : vector<1x32xf32> to vector<8x32xf32>
    %3 = arith.mulf %0, %2 : vector<8x32xf32>
    %cst = arith.constant dense<0.000000e+00> : vector<8xf32>
    %4 = vector.multi_reduction <add>, %3, %cst [1] : vector<8x32xf32> to vector<8xf32>
    %c0_3 = arith.constant 0 : index
    %5 = memref.load %arg3[%c0_3] : memref<1xf32, #tpu.memory_space<smem>>
    %6 = vector.broadcast %5 : f32 to vector<8xf32>
    %7 = arith.addf %4, %6 : vector<8xf32>
    %cst_4 = arith.constant 0.000000e+00 : f32
    %8 = vector.broadcast %cst_4 : f32 to vector<8xf32>
    %9 = arith.subf %8, %7 : vector<8xf32>
    %10 = arith.negf %9 : vector<8xf32>
    %11 = math.exp %10 : vector<8xf32>
    %cst_5 = arith.constant 1.000000e+00 : f32
    %12 = vector.broadcast %cst_5 : f32 to vector<8xf32>
    %13 = arith.addf %12, %11 : vector<8xf32>
    %14 = arith.divf %12, %13 : vector<8xf32>
    %15 = vector.shape_cast %14 : vector<8xf32> to vector<1x8xf32>
    %c0_6 = arith.constant 0 : index
    %c0_7 = arith.constant 0 : index
    %16 = vector.load %arg4[%c0_6, %c0_7] : memref<1x8xf32, #tpu.memory_space<vmem>>, vector<1x8xf32>
    tpu.vector_store %arg4[%c0_6, %c0_7], %15 {strides = array<i32>} : memref<1x8xf32, #tpu.memory_space<vmem>>, vector<1x8xf32>,
    return
  }
  func.func @transform_0(%arg0: i32) -> (i32, i32) {
    %c0_i32 = arith.constant 0 : i32
    %c0_i32_0 = arith.constant 0 : i32
    return %arg0, %c0_i32 : i32, i32
  }
  func.func @transform_1(%arg0: i32) -> (i32, i32) {
    %c0_i32 = arith.constant 0 : i32
    %c0_i32_0 = arith.constant 0 : i32
    %c0_i32_1 = arith.constant 0 : i32
    return %c0_i32, %c0_i32_0 : i32, i32
  }
  func.func @transform_2(%arg0: i32) -> i32 {
    %c0_i32 = arith.constant 0 : i32
    %c0_i32_0 = arith.constant 0 : i32
    return %c0_i32 : i32
  }
  func.func @transform_3(%arg0: i32) -> (i32, i32) {
    %c0_i32 = arith.constant 0 : i32
    %c0_i32_0 = arith.constant 0 : i32
    return %arg0, %c0_i32 : i32, i32
  }
}

</mosaic_0001>

<bundles_post_ra>
// kernel: tpu_custom_call.1
= control target key start
LH: loop header
LB: loop body
LE: loop exit
PB: predicated region body
PF: predicated region fallthrough
CT: control target
= control target key end

     0   :  { %9 = vsyncpa [#allocation4], 0  ;;  %s162_s0 = inlined_call_operand.hbm [shape: f32[8,32], index: 0, kind: input, shape index: {}]   ;;  %s163_s1 = inlined_call_operand.vmem [shape: f32[1,32], index: 1, kind: input, shape index: {}]   ;;  %s164_s2 = inlined_call_operand.<no memory space> [shape: f32[1], index: 2, kind: input, shape index: {}]   ;;  %s165_s3 = inlined_call_operand.hbm [shape: f32[1,8], index: 3, kind: output, shape index: {}]  }
   0x1   :  { %10 = vsyncpa [#allocation5], 0  ;;  %s128_s12 = smov [#allocation3]  }
   0x2   :  { %s17_s13 = sshll.u32 %s128_s12, 4  ;;  %s18_s13 = int_to_ptr.vmem [resolvable:$true] %s17_s13 }
   0x3   :  { %s92_s14 = scalar_lea.vmem %s18_s13, 128  ;;  %p97_p1 = scmp.lt.s32.totalorder %s18_s13, %s18_s13 }
   0x4   :  { %p93_p0 = scmp.ne.s32.totalorder %s18_s13, %s92_s14  ;;  %p98_p2 = scmp.lt.s32.totalorder %s92_s14, %s92_s14 }
   0x6   :  { %p99_p3 = por %p98_p2, %p97_p1 }
   0x8   :  { %p100_p4 = pnand %p99_p3, %p93_p0 }
   0xa   :  { %103 = shalt.err (!%p100_p4)
}
   0xb   :  { %20 = dma.hbm_to_vmem [thread:$0]  %s162_s0, 128, %s18_s13, [#allocation4]  }
   0xc   :  { %124 = dma.done.wait [#allocation4], 128  }
   0xd   :  { %125 = vsyncadd [#allocation4], 4294967168  ;;  %v28_v0 = vld [vmem:[#allocation3] sm:$0xff]  ;;  %vm37_vm0 = vcmask 261120   ;;  %v42_v4 = vstv %s164_s2  ;;  %v52_v11 = vlaneseq  ;;  %s129_s0 = smov [#allocation6]   ;;  %vm59_vm1 = vcmask 57344  }
   0xe   :  { %v76_v1 = vld [vmem:[%s163_s1] ss:$0 sm:$0xff]  ;;  %s67_s1 = sshll.u32 %s129_s0, 4  ;;  %s68_s1 = int_to_ptr.vmem [resolvable:$true] %s67_s1 }
   0xf   :  { %v36_v2 = vmul.f32 %v76_v1, %v28_v0  ;;  %v53_v12 = vand.u32 127, %v52_v11  ;;  %v55_v13 = vshrl.u32 %v52_v11, 7  ;;  %s104_s2 = scalar_lea.vmem %s68_s1, 16  ;;  %s108_s21 = scalar_lea.vmem %s68_s1, 32 }
  0x10   :  { %p105_p5 = scmp.ne.s32.totalorder %s68_s1, %s104_s2  ;;  %p109_p6 = scmp.lt.s32.totalorder %s68_s1, %s68_s1 }
  0x11   :  { %v38_v3 = vsel %vm37_vm0, %v36_v2, 0.0  ;;  %v56_v14 = vsub.s32 %v53_v12, %v55_v13  ;;  %p110_p7 = scmp.lt.s32.totalorder %s108_s21, %s104_s2 }
  0x12   :  { %39 = vadd.xlane.f32.xlu0 %v38_v3 }
  0x13   :  { %p111_p8 = por %p110_p7, %p109_p6 }
  0x15   :  { %p112_p9 = pnand %p111_p8, %p105_p5 }
  0x9b   :  { %v40_v5 = vpop.xlane.xlu0 %39 }
  0x9c   :  { %v43_v6 = vadd.f32 %v42_v4, %v40_v5 }
  0x9e   :  { %v44_v7 = vsub.f32 0.0, %v43_v6 }
  0xa0   :  { %v77_v8 = vmul.f32 -1.442695, %v44_v7 }
  0xa2   :  { %80 = vpow2.f32 %v77_v8 }
  0xaf   :  { %v81_v9 = vpop.eup %80 }
  0xb0   :  { %v48_v10 = vadd.f32 1.0, %v81_v9 }
  0xb2   :  { %82 = vrcp.f32 %v48_v10 }
  0xbf   :  { %v83_v15 = vpop.eup %82 }
  0xc0   :  { %v57_v16 = vrot.slane %v83_v15, %v56_v14 }
  0xc2   :  { %60 = vst.msk [vmem:[#allocation6] sm:$0x1] %vm59_vm1, %v57_v16 }
  0xc3   :  { %115 = shalt.err (!%p112_p9)
}
  0xc4   :  { %70 = dma.vmem_to_hbm [thread:$0]  %s68_s1, 16, %s165_s3, [#allocation5]  }
  0xc5   :  { %126 = dma.done.wait [#allocation5], 16  }
  0xc6   :  { %127 = vsyncadd [#allocation5], 4294967280 }
  0xc7   :  { %74 = vsyncpa [#allocation4], 1 }
  0xc8   :  { %75 = vsyncpa [#allocation5], 1 }

</bundles_post_ra>
